<compile_context>
chip_gen: v5e
topology: v5e:2x2
jax: 0.10.0
libtpu: 0.0.40
codegen_flags: <defaults>
</compile_context>

<pallas_src>
import functools
import math

import jax
import jax.numpy as jnp
from jax import lax
from jax.experimental import pallas as pl
from jax.experimental.pallas import tpu as pltpu


def _round_up(x, m):
    return ((x + m - 1) // m) * m


# ----------------------------------------------------------------------------
# Tiled matmul (fused QKV projection and Wo projection).
# ----------------------------------------------------------------------------
def _matmul_kernel_acc(a_ref, b_ref, o_ref, acc_ref):
    @pl.when(pl.program_id(2) == 0)
    def _():
        acc_ref[...] = jnp.zeros_like(acc_ref)

    acc_ref[...] += jnp.dot(a_ref[...], b_ref[...],
                            preferred_element_type=jnp.float32)

    @pl.when(pl.program_id(2) == pl.num_programs(2) - 1)
    def _():
        o_ref[...] = acc_ref[...].astype(o_ref.dtype)


def _matmul_kernel_single(a_ref, b_ref, o_ref):
    o_ref[...] = jnp.dot(a_ref[...], b_ref[...],
                         preferred_element_type=jnp.float32).astype(o_ref.dtype)


def pallas_matmul(a, b, out_dtype=None):
    """a: (M, K), b: (K, N) -> (M, N). Pads ragged dims to tile multiples."""
    M, K = a.shape
    K2, N = b.shape
    assert K == K2
    out_dtype = out_dtype or a.dtype

    tm = min(512, _round_up(M, 8))
    tn = min(512, _round_up(N, 128))
    tk = _round_up(K, 128) if K <= 512 else 512
    Mp, Np, Kp = _round_up(M, tm), _round_up(N, tn), _round_up(K, tk)

    a_p = a if (Mp == M and Kp == K) else jnp.pad(a, ((0, Mp - M), (0, Kp - K)))
    b_p = b if (Kp == K and Np == N) else jnp.pad(b, ((0, Kp - K), (0, Np - N)))

    if Kp == tk:
        # Whole contraction fits one tile: no reduction grid axis, no accumulator.
        out = pl.pallas_call(
            _matmul_kernel_single,
            out_shape=jax.ShapeDtypeStruct((Mp, Np), out_dtype),
            grid_spec=pltpu.PrefetchScalarGridSpec(
                num_scalar_prefetch=0,
                grid=(Mp // tm, Np // tn),
                in_specs=[
                    pl.BlockSpec((tm, Kp), lambda i, j: (i, 0)),
                    pl.BlockSpec((Kp, tn), lambda i, j: (0, j)),
                ],
                out_specs=pl.BlockSpec((tm, tn), lambda i, j: (i, j)),
            ),
            compiler_params=pltpu.CompilerParams(
                dimension_semantics=("parallel", "parallel")),
        )(a_p, b_p)
    else:
        out = pl.pallas_call(
            _matmul_kernel_acc,
            out_shape=jax.ShapeDtypeStruct((Mp, Np), out_dtype),
            grid_spec=pltpu.PrefetchScalarGridSpec(
                num_scalar_prefetch=0,
                grid=(Mp // tm, Np // tn, Kp // tk),
                in_specs=[
                    pl.BlockSpec((tm, tk), lambda i, j, k: (i, k)),
                    pl.BlockSpec((tk, tn), lambda i, j, k: (k, j)),
                ],
                out_specs=pl.BlockSpec((tm, tn), lambda i, j, k: (i, j)),
                scratch_shapes=[pltpu.VMEM((tm, tn), jnp.float32)],
            ),
            compiler_params=pltpu.CompilerParams(
                dimension_semantics=("parallel", "parallel", "arbitrary")),
        )(a_p, b_p)

    return out if (Mp == M and Np == N) else out[:M, :N]


# ----------------------------------------------------------------------------
# K RoPE: rotate the K columns of the fused qkv slab once per token.
# Columns are already in de-interleaved (even | odd) order (baked into Wk).
# ----------------------------------------------------------------------------
def _k_rope_kernel(k_ref, cos_ref, sin_ref, o_ref, *, n_kv, hd):
    hd2 = hd // 2
    c = cos_ref[...]                      # (ts, hd2) f32
    s = sin_ref[...]
    k = k_ref[0].astype(jnp.float32)      # (ts, n_kv*hd)
    for g in range(n_kv):
        kh = k[:, g * hd:(g + 1) * hd]
        k1, k2 = kh[:, :hd2], kh[:, hd2:]
        o_ref[0, :, g * hd:(g + 1) * hd] = jnp.concatenate(
            [k1 * c - k2 * s, k1 * s + k2 * c], axis=-1).astype(o_ref.dtype)


def rope_k(qkv, cos, sin, *, n_heads, n_kv_heads, head_dim, seq_tile):
    """qkv: (B, Sp, (nh+2*nkv)*hd). Returns rotated K: (B, Sp, nkv*hd)."""
    B, Sp, _ = qkv.shape
    n_rep = n_heads // n_kv_heads
    hd2 = head_dim // 2
    kernel = functools.partial(_k_rope_kernel, n_kv=n_kv_heads, hd=head_dim)
    return pl.pallas_call(
        kernel,
        out_shape=jax.ShapeDtypeStruct((B, Sp, n_kv_heads * head_dim), qkv.dtype),
        grid_spec=pltpu.PrefetchScalarGridSpec(
            num_scalar_prefetch=0,
            grid=(B, Sp // seq_tile),
            in_specs=[
                # Select only the K columns of the fused slab (block index n_rep).
                pl.BlockSpec((1, seq_tile, n_kv_heads * head_dim),
                             lambda b, i: (b, i, n_rep)),
                pl.BlockSpec((seq_tile, hd2), lambda b, i: (i, 0)),
                pl.BlockSpec((seq_tile, hd2), lambda b, i: (i, 0)),
            ],
            out_specs=pl.BlockSpec((1, seq_tile, n_kv_heads * head_dim),
                                   lambda b, i: (b, i, 0)),
        ),
        compiler_params=pltpu.CompilerParams(
            dimension_semantics=("parallel", "parallel")),
    )(qkv, cos, sin)


# ----------------------------------------------------------------------------
# Flash attention (causal, GQA folded), fused Q RoPE, online softmax.
# ----------------------------------------------------------------------------
_NEG = -1e30


def _flash_kernel(q_ref, k_ref, v_ref, cq_ref, sq_ref, o_ref,
                  q_sc, m_sc, l_sc, acc_sc, *, scale, tq, tk, n_rep, hd):
    hd2 = hd // 2
    qi = pl.program_id(2)
    ki = pl.program_id(3)

    @pl.when(ki == 0)
    def _init():
        m_sc[...] = jnp.full_like(m_sc, _NEG)
        l_sc[...] = jnp.zeros_like(l_sc)
        acc_sc[...] = jnp.zeros_like(acc_sc)
        # Hoisted Q RoPE + softmax scale: computed once per q tile, reused for every kv step.
        cq = cq_ref[...]                                   # (tq, hd2) f32
        sq = sq_ref[...]
        q = q_ref[0]                                       # (tq, n_rep*hd) bf16
        for g in range(n_rep):
            qh = q[:, g * hd:(g + 1) * hd].astype(jnp.float32)
            q1, q2 = qh[:, :hd2], qh[:, hd2:]
            qr = jnp.concatenate([q1 * cq - q2 * sq, q1 * sq + q2 * cq], axis=-1)
            q_sc[:, g * hd:(g + 1) * hd] = (qr * scale).astype(q_sc.dtype)

    def _online_step(masked):
        k = k_ref[0]                                       # (tk, hd), pre-rotated
        v = v_ref[0]                                       # (tk, hd)
        for g in range(n_rep):
            qh = q_sc[:, g * hd:(g + 1) * hd]              # rotated + scaled
            s = lax.dot_general(qh, k, (((1,), (1,)), ((), ())),
                                preferred_element_type=jnp.float32)   # (tq, tk)
            if masked:
                # ki == qi and tq == tk: mask is simply row >= col within the tile.
                row = lax.broadcasted_iota(jnp.int32, (tq, tk), 0)
                col = lax.broadcasted_iota(jnp.int32, (tq, tk), 1)
                s = jnp.where(row >= col, s, _NEG)
            m_prev = m_sc[g, :, :]
            m_new = jnp.maximum(m_prev, s.max(axis=-1, keepdims=True))
            alpha = jnp.exp(m_prev - m_new)
            p = jnp.exp(s - m_new)
            l_sc[g, :, :] = alpha * l_sc[g, :, :] + p.sum(axis=-1, keepdims=True)
            acc_sc[:, g * hd:(g + 1) * hd] = (
                alpha * acc_sc[:, g * hd:(g + 1) * hd]
                + jnp.dot(p.astype(v.dtype), v, preferred_element_type=jnp.float32))
            m_sc[g, :, :] = m_new

    @pl.when(ki == qi)        # diagonal tile: causal mask needed
    def _diag():
        _online_step(masked=True)

    @pl.when(ki < qi)         # strictly below diagonal: no mask work
    def _below():
        _online_step(masked=False)

    @pl.when(ki == pl.num_programs(3) - 1)
    def _finalize():
        for g in range(n_rep):
            inv_l = pl.reciprocal(l_sc[g, :, :], approx=True)
            o_ref[0, :, g * hd:(g + 1) * hd] = (
                acc_sc[:, g * hd:(g + 1) * hd] * inv_l).astype(o_ref.dtype)


def flash_attention(qkv, k_rot, cos, sin, *, n_heads, n_kv_heads, head_dim,
                    scale, seq_tile):
    """qkv: (B, Sp, (nh+2*nkv)*hd) bf16 slab; k_rot: (B, Sp, nkv*hd) pre-rotated K;
    cos/sin: (Sp, hd//2) f32. Returns (B, Sp, nh*hd) in token-major layout."""
    B, Sp, _ = qkv.shape
    n_rep = n_heads // n_kv_heads
    hd = head_dim
    hd2 = hd // 2
    tq = tk = seq_tile
    assert Sp % tq == 0

    kernel = functools.partial(_flash_kernel, scale=scale, tq=tq, tk=tk,
                               n_rep=n_rep, hd=hd)
    v_blk = n_heads + n_kv_heads   # block index (of width hd) where V starts in the slab

    return pl.pallas_call(
        kernel,
        out_shape=jax.ShapeDtypeStruct((B, Sp, n_heads * hd), qkv.dtype),
        grid_spec=pltpu.PrefetchScalarGridSpec(
            num_scalar_prefetch=0,
            grid=(B, n_kv_heads, Sp // tq, Sp // tk),
            in_specs=[
                # q: all n_rep query heads of kv head h (contiguous columns of the slab).
                pl.BlockSpec((1, tq, n_rep * hd), lambda b, h, i, j: (b, i, h)),
                # k (pre-rotated): clamp above-diagonal tiles so their DMA is elided.
                pl.BlockSpec((1, tk, hd),
                             lambda b, h, i, j: (b, jnp.minimum(j, i), h)),
                # v straight out of the fused slab, same clamp.
                pl.BlockSpec((1, tk, hd),
                             lambda b, h, i, j: (b, jnp.minimum(j, i), v_blk + h)),
                pl.BlockSpec((tq, hd2), lambda b, h, i, j: (i, 0)),
                pl.BlockSpec((tq, hd2), lambda b, h, i, j: (i, 0)),
            ],
            out_specs=pl.BlockSpec((1, tq, n_rep * hd), lambda b, h, i, j: (b, i, h)),
            scratch_shapes=[
                pltpu.VMEM((tq, n_rep * hd), qkv.dtype),    # rotated + scaled q
                pltpu.VMEM((n_rep, tq, 1), jnp.float32),    # running max
                pltpu.VMEM((n_rep, tq, 1), jnp.float32),    # running denom
                pltpu.VMEM((tq, n_rep * hd), jnp.float32),  # output accumulator
            ],
        ),
        compiler_params=pltpu.CompilerParams(
            dimension_semantics=("parallel", "parallel", "parallel", "arbitrary")),
    )(qkv, k_rot, qkv, cos, sin)


# ----------------------------------------------------------------------------
# Full Attention forward (eval mode, no kv-cache).
# ----------------------------------------------------------------------------
def attention_forward(x, wq, wk, wv, wo, cos, sin, *, n_heads, n_kv_heads,
                      compute_dtype=jnp.bfloat16):
    """x: (bsz, seq, dim); wq:(nh*hd, dim) wk,wv:(nkv*hd, dim) wo:(dim, nh*hd);
    cos/sin: (seq, hd//2) = real/imag of pos_cis. Returns f32 (bsz, seq, dim)."""
    bsz, seq, dim = x.shape
    head_dim = dim // n_heads
    n_rep = n_heads // n_kv_heads
    M = bsz * seq
    scale = 1.0 / math.sqrt(head_dim)

    # Per-head de-interleave permutation (even feats | odd feats) baked into the q/k
    # projection columns -> RoPE in-kernel is two contiguous half-slices; scores are
    # invariant since q and k are permuted identically (V / Wo are untouched).
    p_in = jnp.concatenate([jnp.arange(0, head_dim, 2), jnp.arange(1, head_dim, 2)])

    def head_perm(nh):
        return (jnp.arange(nh)[:, None] * head_dim + p_in[None, :]).reshape(-1)

    # TODO(synk): hoist these transposes/permutes/casts to parameter-load time (done once).
    wq_t = wq.T[:, head_perm(n_heads)]       # (dim, nh*hd)
    wk_t = wk.T[:, head_perm(n_kv_heads)]    # (dim, nkv*hd)
    wv_t = wv.T                              # (dim, nkv*hd)
    wo_t = wo.T                              # (nh*hd, dim)
    wqkv_t = jnp.concatenate([wq_t, wk_t, wv_t], axis=1).astype(compute_dtype)

    # Fused QKV projection (bf16 MXU, f32 accumulation).
    x2d = x.reshape(M, dim).astype(compute_dtype)
    qkv = pallas_matmul(x2d, wqkv_t, out_dtype=compute_dtype)   # (M, (nh+2nkv)*hd)

    qkv_dim = (n_heads + 2 * n_kv_heads) * head_dim
    qkv3 = qkv.reshape(bsz, seq, qkv_dim)                       # free reshape, token-major

    # Pad the sequence to a tile multiple (no-op when already aligned).
    tq = min(128, _round_up(seq, 8))
    Sp = _round_up(seq, tq)
    cos_f = cos.astype(jnp.float32)
    sin_f = sin.astype(jnp.float32)
    if Sp != seq:
        qkv3 = jnp.pad(qkv3, ((0, 0), (0, Sp - seq), (0, 0)))
        cos_f = jnp.pad(cos_f, ((0, Sp - seq), (0, 0)))
        sin_f = jnp.pad(sin_f, ((0, Sp - seq), (0, 0)))

    # Rotate K once per token (Q RoPE is fused inside the flash kernel).
    k_rot = rope_k(qkv3, cos_f, sin_f, n_heads=n_heads, n_kv_heads=n_kv_heads,
                   head_dim=head_dim, seq_tile=tq)

    # Causal flash attention with folded GQA; output is token-major (B, Sp, nh*hd).
    attn = flash_attention(qkv3, k_rot, cos_f, sin_f, n_heads=n_heads,
                           n_kv_heads=n_kv_heads, head_dim=head_dim,
                           scale=scale, seq_tile=tq)

    # Output projection (free reshape, no transpose).
    attn2d = attn[:, :seq].reshape(M, n_heads * head_dim)
    out2d = pallas_matmul(attn2d, wo_t.astype(compute_dtype), out_dtype=jnp.float32)
    return out2d.reshape(bsz, seq, dim)


# ----------------------------------------------------------------------------
# Pure-JAX f32 reference matching the PyTorch module exactly.
# ----------------------------------------------------------------------------
def reference_attention(x, wq, wk, wv, wo, cos, sin, *, n_heads, n_kv_heads):
    bsz, seq, dim = x.shape
    hd = dim // n_heads
    n_rep = n_heads // n_kv_heads

    xq = jnp.einsum("bsd,od->bso", x, wq).reshape(bsz, seq, n_heads, hd)
    xk = jnp.einsum("bsd,od->bso", x, wk).reshape(bsz, seq, n_kv_heads, hd)
    xv = jnp.einsum("bsd,od->bso", x, wv).reshape(bsz, seq, n_kv_heads, hd)

    def rope(t):  # interleaved-pair rotation (== torch.view_as_complex path)
        tr = t.reshape(*t.shape[:-1], hd // 2, 2)
        te, to = tr[..., 0], tr[..., 1]
        c = cos[None, :, None, :]
        s = sin[None, :, None, :]
        return jnp.stack([te * c - to * s, te * s + to * c], axis=-1).reshape(t.shape)

    xq, xk = rope(xq), rope(xk)
    xk = jnp.repeat(xk, n_rep, axis=2)   # repeat_kv (repeat_interleave)
    xv = jnp.repeat(xv, n_rep, axis=2)

    q = xq.transpose(0, 2, 1, 3)
    k = xk.transpose(0, 2, 1, 3)
    v = xv.transpose(0, 2, 1, 3)
    scores = jnp.einsum("bhqd,bhkd->bhqk", q, k) / math.sqrt(hd)
    mask = jnp.triu(jnp.full((seq, seq), -jnp.inf), k=1)
    scores = scores + mask[None, None]
    probs = jax.nn.softmax(scores.astype(jnp.float32), axis=-1).astype(q.dtype)
    out = jnp.einsum("bhqk,bhkd->bhqd", probs, v)
    out = out.transpose(0, 2, 1, 3).reshape(bsz, seq, n_heads * hd)
    return jnp.einsum("bso,do->bsd", out, wo)


if __name__ == "__main__":
    # Small config consistent with the module: dim = n_heads * head_dim, GQA with n_rep=2.
    bsz, seq = 2, 16
    n_heads, n_kv_heads = 2, 1
    head_dim = 128
    dim = n_heads * head_dim          # 256 (lane-dense)

    key = jax.random.PRNGKey(0)
    kx, k1, k2, k3, k4 = jax.random.split(key, 5)
    x = jax.random.normal(kx, (bsz, seq, dim), dtype=jnp.float32)
    wq = jax.random.normal(k1, (n_heads * head_dim, dim), dtype=jnp.float32) * 0.05
    wk = jax.random.normal(k2, (n_kv_heads * head_dim, dim), dtype=jnp.float32) * 0.05
    wv = jax.random.normal(k3, (n_kv_heads * head_dim, dim), dtype=jnp.float32) * 0.05
    wo = jax.random.normal(k4, (dim, n_heads * head_dim), dtype=jnp.float32) * 0.05

    # pos_cis equivalent: cos/sin of the RoPE angles, shape (seq, head_dim // 2).
    freqs = 1.0 / (10000.0 ** (jnp.arange(0, head_dim, 2, dtype=jnp.float32) / head_dim))
    angles = jnp.arange(seq, dtype=jnp.float32)[:, None] * freqs[None, :]
    cos, sin = jnp.cos(angles), jnp.sin(angles)

    out = attention_forward(x, wq, wk, wv, wo, cos, sin,
                            n_heads=n_heads, n_kv_heads=n_kv_heads)
    out = jax.block_until_ready(out)

    ref = reference_attention(x, wq, wk, wv, wo, cos, sin,
                              n_heads=n_heads, n_kv_heads=n_kv_heads)
    assert out.shape == (bsz, seq, dim)
    # bf16 MXU compute with f32 accumulation -> compare against f32 reference with a
    # bf16-appropriate tolerance (any structural bug blows past this by orders of magnitude).
    assert jnp.allclose(out, ref, atol=5e-2, rtol=5e-2), "mismatch vs reference"

    print("KERNEL_OK")
</pallas_src>

<mosaic_0001>
module attributes {stable_mosaic.version = 11 : i64} {
  func.func @_matmul_kernel_single(%arg0: i32, %arg1: i32, %arg2: memref<32x256xbf16, #tpu.memory_space<vmem>>, %arg3: memref<256x512xbf16, #tpu.memory_space<vmem>>, %arg4: memref<32x512xbf16, #tpu.memory_space<vmem>>) attributes {dimension_semantics = [#tpu.dimension_semantics<parallel>, #tpu.dimension_semantics<parallel>], iteration_bounds = array<i64: 1, 1>, scalar_prefetch = 0 : i64, scratch_operands = 0 : i64, tpu.core_type = #tpu.core_type<tc>, window_params = [{transform_indices = @transform_0, window_bounds = array<i64: 32, 256>}, {transform_indices = @transform_1, window_bounds = array<i64: 256, 512>}, {transform_indices = @transform_2, window_bounds = array<i64: 32, 512>}]} {
    %c0 = arith.constant 0 : index
    %c0_0 = arith.constant 0 : index
    %0 = vector.load %arg2[%c0, %c0_0] : memref<32x256xbf16, #tpu.memory_space<vmem>>, vector<32x256xbf16>
    %c0_1 = arith.constant 0 : index
    %c0_2 = arith.constant 0 : index
    %1 = vector.load %arg3[%c0_1, %c0_2] : memref<256x512xbf16, #tpu.memory_space<vmem>>, vector<256x512xbf16>
    %cst = arith.constant dense<0.000000e+00> : vector<32x512xf32>
    %2 = tpu.matmul %0, %1, %cst {dimension_numbers = #tpu.dot_dimension_numbers<[1], [0], [0], [1], [0, 0, 1, 1], [], []>} : vector<32x256xbf16>, vector<256x512xbf16>, vector<32x512xf32> -> vector<32x512xf32>
    %3 = arith.truncf %2 : vector<32x512xf32> to vector<32x512xbf16>
    %c0_3 = arith.constant 0 : index
    %c0_4 = arith.constant 0 : index
    %4 = vector.load %arg4[%c0_3, %c0_4] : memref<32x512xbf16, #tpu.memory_space<vmem>>, vector<32x512xbf16>
    tpu.vector_store %arg4[%c0_3, %c0_4], %3 {strides = array<i32>} : memref<32x512xbf16, #tpu.memory_space<vmem>>, vector<32x512xbf16>,
    return
  }
  func.func @transform_0(%arg0: i32, %arg1: i32) -> (i32, i32) {
    %c0_i32 = arith.constant 0 : i32
    %c0_i32_0 = arith.constant 0 : i32
    return %arg0, %c0_i32 : i32, i32
  }
  func.func @transform_1(%arg0: i32, %arg1: i32) -> (i32, i32) {
    %c0_i32 = arith.constant 0 : i32
    %c0_i32_0 = arith.constant 0 : i32
    return %c0_i32, %arg1 : i32, i32
  }
  func.func @transform_2(%arg0: i32, %arg1: i32) -> (i32, i32) {
    %c0_i32 = arith.constant 0 : i32
    return %arg0, %arg1 : i32, i32
  }
}

</mosaic_0001>

<bundles_post_ra>
// kernel: tpu_custom_call.1
= control target key start
LH: loop header
LB: loop body
LE: loop exit
PB: predicated region body
PF: predicated region fallthrough
CT: control target
= control target key end

     0   :  { %7 = vsyncpa [#allocation3], 0  ;;  %s1126_s0 = inlined_call_operand.hbm [shape: bf16[32,256], index: 0, kind: input, shape index: {}]   ;;  %s1127_s1 = inlined_call_operand.hbm [shape: bf16[256,512], index: 1, kind: input, shape index: {}]   ;;  %s1128_s2 = inlined_call_operand.hbm [shape: bf16[32,512], index: 2, kind: output, shape index: {}]  }
   0x1   :  { %8 = vsyncpa [#allocation6], 0 }
   0x2   :  { %9 = vsyncpa [#allocation4], 0  ;;  %s14_s11 = sshll.u32 %s1126_s0, 4  ;;  %s1065_s12 = smov [#allocation2]   ;;  %s15_s11 = int_to_ptr.hbm [resolvable:$true] %s14_s11 }
   0x3   :  { %s16_s13 = sshll.u32 %s1065_s12, 4  ;;  %s27_s16 = sshll.u32 %s1127_s1, 4  ;;  %s17_s13 = int_to_ptr.vmem [resolvable:$true] %s16_s13  ;;  %s28_s16 = int_to_ptr.hbm [resolvable:$true] %s27_s16 }
   0x4   :  { %s1066_s17 = smov 128   ;;  %s1067_s18 = smov 8  }
   0x5   :  { %22 = dma.hbm_to_vmem [thread:$0]  %s15_s11, 512, %s17_s13, [#allocation3], %s1066_s17, %s1066_s17, %s1067_s18  }
   0x6   :  { %s1068_s19 = smov [#allocation5]   ;;  %s1069_s21 = smov 256  }
   0x7   :  { %s29_s20 = sshll.u32 %s1068_s19, 4  ;;  %s1070_s22 = smov 16   ;;  %s30_s20 = int_to_ptr.vmem [resolvable:$true] %s29_s20 }
   0x8   :  { %35 = dma.hbm_to_vmem [thread:$0]  %s28_s16, 8192, %s30_s20, [#allocation6], %s1069_s21, %s1069_s21, %s1070_s22  }
   0x9   :  { %1059 = dma.done.wait [#allocation3], 512  }
   0xa   :  { %1060 = vsyncadd [#allocation3], 4294966784 }
   0xb   :  { %1061 = dma.done.wait [#allocation6], 8192  }
   0xc   :  { %1062 = vsyncadd [#allocation6], 4294959104  ;;  %v770_v0 = vld [vmem:[#allocation5 + $0xe0] sm:$0xf]  ;;  %v946_v1 = vld [vmem:[#allocation5 + $0xec] sm:$0xf0] }
   0xd   :  { %v898_v2 = vld [vmem:[#allocation5 + $0x1e0] sm:$0xf]  ;;  %v771_v3 = vor.u32 %v946_v1, %v770_v0  ;;  %v978_v4 = vld [vmem:[#allocation5 + $0x1ec] sm:$0xf0]  ;;  %v944_v5 = vld [vmem:[#allocation5 + $0xe4] sm:$0xf] }
   0xe   :  { %v772_v6 = vld [vmem:[#allocation5 + $0xf0] sm:$0xf0]  ;;  %v899_v7 = vor.u32 %v978_v4, %v898_v2  ;;  %v976_v9 = vld [vmem:[#allocation5 + $0x1e4] sm:$0xf]  ;;  %v754_v11 = vld [vmem:[#allocation5 + $0xc0] sm:$0xf] }
   0xf   :  { %v775_v8 = vor.u32 %v944_v5, %v772_v6  ;;  %v900_v10 = vld [vmem:[#allocation5 + $0x1f0] sm:$0xf0]  ;;  %452 = vmatpush.bf16.msra.mxu0 %v771_v3  ;;  %v942_v13 = vld [vmem:[#allocation5 + $0xcc] sm:$0xf0]  ;;  %v882_v14 = vld [vmem:[#allocation5 + $0x1c0] sm:$0xf] }
  0x10   :  { %v903_v12 = vor.u32 %v976_v9, %v900_v10  ;;  %v974_v15 = vld [vmem:[#allocation5 + $0x1cc] sm:$0xf0]  ;;  %471 = vmatpush.bf16.msra.mxu1 %v899_v7  ;;  %v755_v16 = vor.u32 %v942_v13, %v754_v11  ;;  %v940_v18 = vld [vmem:[#allocation5 + $0xc4] sm:$0xf]  ;;  %v756_v19 = vld [vmem:[#allocation5 + $0xd0] sm:$0xf0] }
  0x11   :  { %490 = vmatpush.bf16.msra.mxu2 %v775_v8  ;;  %v883_v17 = vor.u32 %v974_v15, %v882_v14  ;;  %v972_v20 = vld [vmem:[#allocation5 + $0x1c4] sm:$0xf]  ;;  %v759_v21 = vor.u32 %v940_v18, %v756_v19  ;;  %v884_v22 = vld [vmem:[#allocation5 + $0x1d0] sm:$0xf0]  ;;  %v738_v23 = vld [vmem:[#allocation5 + $0xa0] sm:$0xf] }
  0x12   :  { %509 = vmatpush.bf16.msra.mxu3 %v903_v12  ;;  %v938_v24 = vld [vmem:[#allocation5 + $0xac] sm:$0xf0]  ;;  %v887_v25 = vor.u32 %v972_v20, %v884_v22  ;;  %v866_v26 = vld [vmem:[#allocation5 + $0x1a0] sm:$0xf]  ;;  %v936_v28 = vld [vmem:[#allocation5 + $0xa4] sm:$0xf] }
  0x13   :  { %v970_v27 = vld [vmem:[#allocation5 + $0x1ac] sm:$0xf0]  ;;  %453 = vmatpush.bf16.msra.mxu0 %v755_v16  ;;  %v739_v29 = vor.u32 %v938_v24, %v738_v23  ;;  %v740_v30 = vld [vmem:[#allocation5 + $0xb0] sm:$0xf0]  ;;  %v968_v31 = vld [vmem:[#allocation5 + $0x1a4] sm:$0xf] }
  0x14   :  { %v868_v32 = vld [vmem:[#allocation5 + $0x1b0] sm:$0xf0]  ;;  %472 = vmatpush.bf16.msra.mxu1 %v883_v17  ;;  %v867_v33 = vor.u32 %v970_v27, %v866_v26  ;;  %v743_v34 = vor.u32 %v936_v28, %v740_v30  ;;  %v722_v35 = vld [vmem:[#allocation5 + $0x80] sm:$0xf]  ;;  %v934_v36 = vld [vmem:[#allocation5 + $0x8c] sm:$0xf0] }
  0x15   :  { %491 = vmatpush.bf16.msra.mxu2 %v759_v21  ;;  %v850_v37 = vld [vmem:[#allocation5 + $0x180] sm:$0xf]  ;;  %v871_v38 = vor.u32 %v968_v31, %v868_v32  ;;  %v966_v39 = vld [vmem:[#allocation5 + $0x18c] sm:$0xf0]  ;;  %v932_v40 = vld [vmem:[#allocation5 + $0x84] sm:$0xf]  ;;  %v723_v44 = vor.u32 %v934_v36, %v722_v35 }
  0x16   :  { %510 = vmatpush.bf16.msra.mxu3 %v887_v25  ;;  %v724_v41 = vld [vmem:[#allocation5 + $0x90] sm:$0xf0]  ;;  %v964_v42 = vld [vmem:[#allocation5 + $0x184] sm:$0xf]  ;;  %v851_v45 = vor.u32 %v966_v39, %v850_v37  ;;  %v706_v47 = vld [vmem:[#allocation5 + $0x60] sm:$0xf] }
  0x17   :  { %v852_v43 = vld [vmem:[#allocation5 + $0x190] sm:$0xf0]  ;;  %454 = vmatpush.bf16.msra.mxu0 %v739_v29  ;;  %v727_v46 = vor.u32 %v932_v40, %v724_v41  ;;  %v930_v48 = vld [vmem:[#allocation5 + $0x6c] sm:$0xf0]  ;;  %v834_v49 = vld [vmem:[#allocation5 + $0x160] sm:$0xf] }
  0x18   :  { %473 = vmatpush.bf16.msra.mxu1 %v867_v33  ;;  %v855_v50 = vor.u32 %v964_v42, %v852_v43  ;;  %v962_v51 = vld [vmem:[#allocation5 + $0x16c] sm:$0xf0]  ;;  %v928_v52 = vld [vmem:[#allocation5 + $0x64] sm:$0xf]  ;;  %v708_v53 = vld [vmem:[#allocation5 + $0x70] sm:$0xf0]  ;;  %v707_v56 = vor.u32 %v930_v48, %v706_v47 }
  0x19   :  { %492 = vmatpush.bf16.msra.mxu2 %v743_v34  ;;  %v960_v54 = vld [vmem:[#allocation5 + $0x164] sm:$0xf]  ;;  %v836_v55 = vld [vmem:[#allocation5 + $0x170] sm:$0xf0]  ;;  %v835_v57 = vor.u32 %v962_v51, %v834_v49  ;;  %v711_v58 = vor.u32 %v928_v52, %v708_v53  ;;  %v690_v59 = vld [vmem:[#allocation5 + $0x40] sm:$0xf] }
  0x1a   :  { %511 = vmatpush.bf16.msra.mxu3 %v871_v38  ;;  %v926_v60 = vld [vmem:[#allocation5 + $0x4c] sm:$0xf0]  ;;  %v818_v61 = vld [vmem:[#allocation5 + $0x140] sm:$0xf]  ;;  %v839_v62 = vor.u32 %v960_v54, %v836_v55  ;;  %v924_v0 = vld [vmem:[#allocation5 + $0x44] sm:$0xf] }
  0x1b   :  { %455 = vmatpush.bf16.msra.mxu0 %v723_v44  ;;  %v958_v63 = vld [vmem:[#allocation5 + $0x14c] sm:$0xf0]  ;;  %v692_v1 = vld [vmem:[#allocation5 + $0x50] sm:$0xf0]  ;;  %v956_v2 = vld [vmem:[#allocation5 + $0x144] sm:$0xf]  ;;  %v691_v4 = vor.u32 %v926_v60, %v690_v59 }
  0x1c   :  { %474 = vmatpush.bf16.msra.mxu1 %v851_v45  ;;  %v820_v3 = vld [vmem:[#allocation5 + $0x150] sm:$0xf0]  ;;  %v819_v5 = vor.u32 %v958_v63, %v818_v61  ;;  %v695_v6 = vor.u32 %v924_v0, %v692_v1  ;;  %v674_v7 = vld [vmem:[#allocation5 + $0x20] sm:$0xf]  ;;  %v922_v8 = vld [vmem:[#allocation5 + $0x2c] sm:$0xf0] }
  0x1d   :  { %493 = vmatpush.bf16.msra.mxu2 %v727_v46  ;;  %v802_v9 = vld [vmem:[#allocation5 + $0x120] sm:$0xf]  ;;  %v823_v10 = vor.u32 %v956_v2, %v820_v3  ;;  %v954_v11 = vld [vmem:[#allocation5 + $0x12c] sm:$0xf0]  ;;  %v920_v12 = vld [vmem:[#allocation5 + $0x24] sm:$0xf]  ;;  %v675_v16 = vor.u32 %v922_v8, %v674_v7 }
  0x1e   :  { %512 = vmatpush.bf16.msra.mxu3 %v855_v50  ;;  %v676_v13 = vld [vmem:[#allocation5 + $0x30] sm:$0xf0]  ;;  %v952_v14 = vld [vmem:[#allocation5 + $0x124] sm:$0xf]  ;;  %v658_v17 = vld [vmem:[#allocation5] sm:$0xf]  ;;  %v803_v19 = vor.u32 %v954_v11, %v802_v9 }
  0x1f   :  { %456 = vmatpush.bf16.msra.mxu0 %v707_v56  ;;  %v804_v15 = vld [vmem:[#allocation5 + $0x130] sm:$0xf0]  ;;  %v918_v18 = vld [vmem:[#allocation5 + $0xc] sm:$0xf0]  ;;  %v679_v20 = vor.u32 %v920_v12, %v676_v13  ;;  %v786_v21 = vld [vmem:[#allocation5 + $0x100] sm:$0xf] }
  0x20   :  { %475 = vmatpush.bf16.msra.mxu1 %v835_v57  ;;  %v950_v22 = vld [vmem:[#allocation5 + $0x10c] sm:$0xf0]  ;;  %v916_v23 = vld [vmem:[#allocation5 + $0x4] sm:$0xf]  ;;  %v807_v24 = vor.u32 %v952_v14, %v804_v15  ;;  %v660_v25 = vld [vmem:[#allocation5 + $0x10] sm:$0xf0]  ;;  %v659_v31 = vor.u32 %v918_v18, %v658_v17 }
  0x21   :  { %494 = vmatpush.bf16.msra.mxu2 %v711_v58  ;;  %v948_v26 = vld [vmem:[#allocation5 + $0x104] sm:$0xf]  ;;  %v788_v27 = vld [vmem:[#allocation5 + $0x110] sm:$0xf0]  ;;  %v642_v28 = vld [vmem:[#allocation2] sm:$0xf]  ;;  %v787_v35 = vor.u32 %v950_v22, %v786_v21  ;;  %v663_v36 = vor.u32 %v916_v23, %v660_v25 }
  0x22   :  { %513 = vmatpush.bf16.msra.mxu3 %v839_v62  ;;  %v945_v29 = vld [vmem:[#allocation5 + $0xec] sm:$0xf]  ;;  %v780_v30 = vld [vmem:[#allocation5 + $0xf8] sm:$0xf0]  ;;  %v913_v32 = vld [vmem:[#allocation2 + $0x4] sm:$0xf0]  ;;  %v791_v39 = vor.u32 %v948_v26, %v788_v27 }
  0x23   :  { %457 = vmatpush.bf16.msra.mxu0 %v691_v4  ;;  %v977_v33 = vld [vmem:[#allocation5 + $0x1ec] sm:$0xf]  ;;  %v908_v34 = vld [vmem:[#allocation5 + $0x1f8] sm:$0xf0]  ;;  %v912_v37 = vld [vmem:[#allocation2 + $0x4] sm:$0xf]  ;;  %v783_v40 = vor.u32 %v945_v29, %v780_v30  ;;  %v1096_v44 = vor.u32 %v913_v32, %v642_v28 }
  0x24   :  { %476 = vmatpush.bf16.msra.mxu1 %v819_v5  ;;  %v644_v38 = vld [vmem:[#allocation2 + $0x8] sm:$0xf0]  ;;  %v778_v41 = vld [vmem:[#allocation5 + $0xe8] sm:$0xf]  ;;  %v947_v42 = vld [vmem:[#allocation5 + $0xf4] sm:$0xf0]  ;;  %v911_v45 = vor.u32 %v977_v33, %v908_v34 }
  0x25   :  { %495 = vmatpush.bf16.msra.mxu2 %v695_v6  ;;  %v906_v43 = vld [vmem:[#allocation5 + $0x1e8] sm:$0xf]  ;;  %v979_v46 = vld [vmem:[#allocation5 + $0x1f4] sm:$0xf0]  ;;  %v941_v47 = vld [vmem:[#allocation5 + $0xcc] sm:$0xf]  ;;  %v1098_v49 = vor.u32 %v912_v37, %v644_v38  ;;  %v779_v52 = vor.u32 %v947_v42, %v778_v41 }
  0x26   :  { %514 = vmatpush.bf16.msra.mxu3 %v823_v10  ;;  %v764_v48 = vld [vmem:[#allocation5 + $0xd8] sm:$0xf0]  ;;  %v973_v50 = vld [vmem:[#allocation5 + $0x1cc] sm:$0xf]  ;;  %v907_v53 = vor.u32 %v979_v46, %v906_v43  ;;  %v762_v55 = vld [vmem:[#allocation5 + $0xc8] sm:$0xf] }
  0x27   :  { %458 = vmatpush.bf16.msra.mxu0 %v675_v16  ;;  %v892_v51 = vld [vmem:[#allocation5 + $0x1d8] sm:$0xf0]  ;;  %v767_v54 = vor.u32 %v941_v47, %v764_v48  ;;  %v943_v56 = vld [vmem:[#allocation5 + $0xd4] sm:$0xf0]  ;;  %v890_v57 = vld [vmem:[#allocation5 + $0x1c8] sm:$0xf] }
  0x28   :  { %477 = vmatpush.bf16.msra.mxu1 %v803_v19  ;;  %v895_v58 = vor.u32 %v973_v50, %v892_v51  ;;  %v975_v59 = vld [vmem:[#allocation5 + $0x1d4] sm:$0xf0]  ;;  %v937_v60 = vld [vmem:[#allocation5 + $0xac] sm:$0xf]  ;;  %v748_v61 = vld [vmem:[#allocation5 + $0xb8] sm:$0xf0]  ;;  %v763_v0 = vor.u32 %v943_v56, %v762_v55 }
  0x29   :  { %496 = vmatpush.bf16.msra.mxu2 %v679_v20  ;;  %v969_v62 = vld [vmem:[#allocation5 + $0x1ac] sm:$0xf]  ;;  %v876_v63 = vld [vmem:[#allocation5 + $0x1b8] sm:$0xf0]  ;;  %v891_v1 = vor.u32 %v975_v59, %v890_v57  ;;  %v751_v2 = vor.u32 %v937_v60, %v748_v61  ;;  %v746_v3 = vld [vmem:[#allocation5 + $0xa8] sm:$0xf] }
  0x2a   :  { %515 = vmatpush.bf16.msra.mxu3 %v807_v24  ;;  %v939_v4 = vld [vmem:[#allocation5 + $0xb4] sm:$0xf0]  ;;  %v874_v5 = vld [vmem:[#allocation5 + $0x1a8] sm:$0xf]  ;;  %v879_v6 = vor.u32 %v969_v62, %v876_v63  ;;  %v933_v8 = vld [vmem:[#allocation5 + $0x8c] sm:$0xf] }
  0x2b   :  { %459 = vmatpush.bf16.msra.mxu0 %v659_v31  ;;  %v971_v7 = vld [vmem:[#allocation5 + $0x1b4] sm:$0xf0]  ;;  %v732_v9 = vld [vmem:[#allocation5 + $0x98] sm:$0xf0]  ;;  %v965_v10 = vld [vmem:[#allocation5 + $0x18c] sm:$0xf]  ;;  %v747_v12 = vor.u32 %v939_v4, %v746_v3 }
  0x2c   :  { %478 = vmatpush.bf16.msra.mxu1 %v787_v35  ;;  %v860_v11 = vld [vmem:[#allocation5 + $0x198] sm:$0xf0]  ;;  %v730_v13 = vld [vmem:[#allocation5 + $0x88] sm:$0xf]  ;;  %v875_v14 = vor.u32 %v971_v7, %v874_v5  ;;  %v735_v15 = vor.u32 %v933_v8, %v732_v9  ;;  %v935_v16 = vld [vmem:[#allocation5 + $0x94] sm:$0xf0] }
  0x2d   :  { %497 = vmatpush.bf16.msra.mxu2 %v663_v36  ;;  %v858_v17 = vld [vmem:[#allocation5 + $0x188] sm:$0xf]  ;;  %v967_v18 = vld [vmem:[#allocation5 + $0x194] sm:$0xf0]  ;;  %v863_v19 = vor.u32 %v965_v10, %v860_v11  ;;  %v650_v20 = vld [vmem:[#allocation2 + $0x10] sm:$0xf]  ;;  %v731_v26 = vor.u32 %v935_v16, %v730_v13 }
  0x2e   :  { %516 = vmatpush.bf16.msra.mxu3 %v791_v39  ;;  %460 = vmatmul.bf16.vlgmr.msra.gmra.mxu0 %v1096_v44  ;;  %v929_v21 = vld [vmem:[#allocation5 + $0x6c] sm:$0xf]  ;;  %v716_v22 = vld [vmem:[#allocation5 + $0x78] sm:$0xf0]  ;;  %v915_v23 = vld [vmem:[#allocation2 + $0x14] sm:$0xf0]  ;;  %v859_v29 = vor.u32 %v967_v18, %v858_v17 }
  0x2f   :  { %479 = vmatmul.bf16.vlgmr.msra.gmra.mxu1 %v1098_v49  ;;  %528 = vmatpush.bf16.msrb.mxu0 %v779_v52  ;;  %v961_v24 = vld [vmem:[#allocation5 + $0x16c] sm:$0xf]  ;;  %v844_v25 = vld [vmem:[#allocation5 + $0x178] sm:$0xf0]  ;;  %v914_v27 = vld [vmem:[#allocation2 + $0x14] sm:$0xf]  ;;  %v719_v30 = vor.u32 %v929_v21, %v716_v22  ;;  %v1104_v34 = vor.u32 %v915_v23, %v650_v20 }
  0x30   :  { %498 = vmatmul.bf16.vlgmr.msra.gmra.mxu2 %v1096_v44  ;;  %547 = vmatpush.bf16.msrb.mxu1 %v907_v53  ;;  %v652_v28 = vld [vmem:[#allocation2 + $0x18] sm:$0xf0]  ;;  %v714_v31 = vld [vmem:[#allocation5 + $0x68] sm:$0xf]  ;;  %v931_v32 = vld [vmem:[#allocation5 + $0x74] sm:$0xf0]  ;;  %v847_v35 = vor.u32 %v961_v24, %v844_v25 }
  0x31   :  { %566 = vmatpush.bf16.msrb.mxu2 %v783_v40  ;;  %517 = vmatmul.bf16.vlgmr.msra.gmra.mxu3 %v1098_v49  ;;  %v842_v33 = vld [vmem:[#allocation5 + $0x168] sm:$0xf]  ;;  %v963_v36 = vld [vmem:[#allocation5 + $0x174] sm:$0xf0]  ;;  %v925_v37 = vld [vmem:[#allocation5 + $0x4c] sm:$0xf]  ;;  %v1106_v39 = vor.u32 %v914_v27, %v652_v28  ;;  %v715_v42 = vor.u32 %v931_v32, %v714_v31 }
  0x32   :  { %585 = vmatpush.bf16.msrb.mxu3 %v911_v45  ;;  %v700_v38 = vld [vmem:[#allocation5 + $0x58] sm:$0xf0]  ;;  %v957_v40 = vld [vmem:[#allocation5 + $0x14c] sm:$0xf]  ;;  %v843_v43 = vor.u32 %v963_v36, %v842_v33  ;;  %v698_v46 = vld [vmem:[#allocation5 + $0x48] sm:$0xf] }
  0x33   :  { %529 = vmatpush.bf16.msrb.mxu0 %v763_v0  ;;  %v828_v41 = vld [vmem:[#allocation5 + $0x158] sm:$0xf0]  ;;  %v703_v45 = vor.u32 %v925_v37, %v700_v38  ;;  %v927_v47 = vld [vmem:[#allocation5 + $0x54] sm:$0xf0]  ;;  %v826_v48 = vld [vmem:[#allocation5 + $0x148] sm:$0xf] }
  0x34   :  { %548 = vmatpush.bf16.msrb.mxu1 %v891_v1  ;;  %v831_v50 = vor.u32 %v957_v40, %v828_v41  ;;  %v959_v51 = vld [vmem:[#allocation5 + $0x154] sm:$0xf0]  ;;  %v921_v52 = vld [vmem:[#allocation5 + $0x2c] sm:$0xf]  ;;  %v684_v53 = vld [vmem:[#allocation5 + $0x38] sm:$0xf0]  ;;  %v699_v56 = vor.u32 %v927_v47, %v698_v46 }
  0x35   :  { %567 = vmatpush.bf16.msrb.mxu2 %v767_v54  ;;  %v953_v54 = vld [vmem:[#allocation5 + $0x12c] sm:$0xf]  ;;  %v812_v55 = vld [vmem:[#allocation5 + $0x138] sm:$0xf0]  ;;  %v827_v57 = vor.u32 %v959_v51, %v826_v48  ;;  %v682_v59 = vld [vmem:[#allocation5 + $0x28] sm:$0xf] }
  0x36   :  { %586 = vmatpush.bf16.msrb.mxu3 %v895_v58  ;;  %v687_v58 = vor.u32 %v921_v52, %v684_v53  ;;  %v923_v60 = vld [vmem:[#allocation5 + $0x34] sm:$0xf0]  ;;  %v810_v61 = vld [vmem:[#allocation5 + $0x128] sm:$0xf]  ;;  %v815_v62 = vor.u32 %v953_v54, %v812_v55  ;;  %v917_v0 = vld [vmem:[#allocation5 + $0xc] sm:$0xf] }
  0x37   :  { %530 = vmatpush.bf16.msrb.mxu0 %v747_v12  ;;  %v955_v63 = vld [vmem:[#allocation5 + $0x134] sm:$0xf0]  ;;  %v668_v1 = vld [vmem:[#allocation5 + $0x18] sm:$0xf0]  ;;  %v683_v4 = vor.u32 %v923_v60, %v682_v59  ;;  %v666_v7 = vld [vmem:[#allocation5 + $0x8] sm:$0xf] }
  0x38   :  { %549 = vmatpush.bf16.msrb.mxu1 %v875_v14  ;;  %v796_v3 = vld [vmem:[#allocation5 + $0x118] sm:$0xf0]  ;;  %v811_v5 = vor.u32 %v955_v63, %v810_v61  ;;  %v919_v8 = vld [vmem:[#allocation5 + $0x14] sm:$0xf0]  ;;  %v794_v10 = vld [vmem:[#allocation5 + $0x108] sm:$0xf] }
  0x39   :  { %568 = vmatpush.bf16.msrb.mxu2 %v751_v2  ;;  %v949_v2 = vld [vmem:[#allocation5 + $0x10c] sm:$0xf]  ;;  %v951_v11 = vld [vmem:[#allocation5 + $0x114] sm:$0xf0]  ;;  %v667_v12 = vor.u32 %v919_v8, %v666_v7  ;;  %s1071_s0 = smov [#allocation7]   ;;  %s626_s25 = sshll.u32 %s1128_s2, 4  ;;  %s627_s25 = int_to_ptr.hbm [resolvable:$true] %s626_s25 }
  0x3a   :  { %587 = vmatpush.bf16.msrb.mxu3 %v879_v6  ;;  %v671_v6 = vor.u32 %v917_v0, %v668_v1  ;;  %v799_v9 = vor.u32 %v949_v2, %v796_v3  ;;  %v795_v13 = vor.u32 %v951_v11, %v794_v10  ;;  %s624_s1 = sshll.u32 %s1071_s0, 4  ;;  %s625_s1 = int_to_ptr.vmem [resolvable:$true] %s624_s1 }
  0x3b   :  { %531 = vmatpush.bf16.msrb.mxu0 %v731_v26 }
  0x3c   :  { %550 = vmatpush.bf16.msrb.mxu1 %v859_v29 }
  0x3d   :  { %569 = vmatpush.bf16.msrb.mxu2 %v735_v15 }
  0x3e   :  { %588 = vmatpush.bf16.msrb.mxu3 %v863_v19  ;;  %465 = vmatmul.bf16.gmra.mxu0 %v1104_v34 }
  0x3f   :  { %484 = vmatmul.bf16.gmra.mxu1 %v1106_v39  ;;  %532 = vmatpush.bf16.msrb.mxu0 %v715_v42 }
  0x40   :  { %503 = vmatmul.bf16.gmra.mxu2 %v1104_v34  ;;  %551 = vmatpush.bf16.msrb.mxu1 %v843_v43 }
  0x41   :  { %570 = vmatpush.bf16.msrb.mxu2 %v719_v30  ;;  %522 = vmatmul.bf16.gmra.mxu3 %v1106_v39 }
  0x42   :  { %589 = vmatpush.bf16.msrb.mxu3 %v847_v35 }
  0x43   :  { %533 = vmatpush.bf16.msrb.mxu0 %v699_v56 }
  0x44   :  { %552 = vmatpush.bf16.msrb.mxu1 %v827_v57 }
  0x45   :  { %571 = vmatpush.bf16.msrb.mxu2 %v703_v45 }
  0x46   :  { %590 = vmatpush.bf16.msrb.mxu3 %v831_v50 }
  0x47   :  { %534 = vmatpush.bf16.msrb.mxu0 %v683_v4 }
  0x48   :  { %553 = vmatpush.bf16.msrb.mxu1 %v811_v5 }
  0x49   :  { %572 = vmatpush.bf16.msrb.mxu2 %v687_v58 }
  0x4a   :  { %591 = vmatpush.bf16.msrb.mxu3 %v815_v62 }
  0x4b   :  { %535 = vmatpush.bf16.msrb.mxu0 %v667_v12 }
  0x4c   :  { %554 = vmatpush.bf16.msrb.mxu1 %v795_v13 }
  0x4d   :  { %573 = vmatpush.bf16.msrb.mxu2 %v671_v6 }
  0x4e   :  { %592 = vmatpush.bf16.msrb.mxu3 %v799_v9  ;;  %536 = vmatmul.bf16.vlgmr.msrb.gmra.mxu0 %v1096_v44 }
  0x4f   :  { %555 = vmatmul.bf16.vlgmr.msrb.gmra.mxu1 %v1098_v49 }
  0x50   :  { %574 = vmatmul.bf16.vlgmr.msrb.gmra.mxu2 %v1096_v44 }
  0x51   :  { %593 = vmatmul.bf16.vlgmr.msrb.gmra.mxu3 %v1098_v49 }
  0x5e   :  { %541 = vmatmul.bf16.gmra.mxu0 %v1104_v34 }
  0x5f   :  { %560 = vmatmul.bf16.gmra.mxu1 %v1106_v39 }
  0x60   :  { %579 = vmatmul.bf16.gmra.mxu2 %v1104_v34 }
  0x61   :  { %598 = vmatmul.bf16.gmra.mxu3 %v1106_v39 }
  0xab   :  { %v461_v14 = vpop.f32.mrf.mxu0 }
  0xac   :  { %v480_v15 = vpop.f32.mrf.mxu1 }
  0xad   :  { %v481_v16 = vadd.f32 %v480_v15, %v461_v14 }
  0xb3   :  { %v499_v17 = vpop.f32.mrf.mxu2  ;;  %v463_v19 = vpop.f32.mrf.mxu0 }
  0xb4   :  { %v518_v18 = vpop.f32.mrf.mxu3  ;;  %v482_v44 = vpop.f32.mrf.mxu1 }
  0xb5   :  { %v519_v20 = vadd.f32 %v518_v18, %v499_v17  ;;  %v483_v24 = vadd.f32 %v482_v44, %v463_v19 }
  0xb7   :  { %v604_v21 = vpack.c.bf16 %v519_v20, %v481_v16 }
  0xb9   :  { %612 = vst [vmem:[#allocation7] sm:$0xff] %v604_v21 }
  0xbb   :  { %v501_v22 = vpop.f32.mrf.mxu2  ;;  %v466_v23 = vpop.f32.mrf.mxu0 }
  0xbc   :  { %v520_v49 = vpop.f32.mrf.mxu3  ;;  %v485_v26 = vpop.f32.mrf.mxu1 }
  0xbd   :  { %v521_v25 = vadd.f32 %v520_v49, %v501_v22  ;;  %v486_v28 = vadd.f32 %v485_v26, %v466_v23 }
  0xbf   :  { %v606_v27 = vpack.c.bf16 %v521_v25, %v483_v24 }
  0xc1   :  { %614 = vst [vmem:[#allocation7 + $0x10] sm:$0xff] %v606_v27 }
  0xc3   :  { %v504_v29 = vpop.f32.mrf.mxu2  ;;  %v468_v31 = vpop.f32.mrf.mxu0 }
  0xc4   :  { %v523_v30 = vpop.f32.mrf.mxu3  ;;  %v487_v33 = vpop.f32.mrf.mxu1 }
  0xc5   :  { %v524_v32 = vadd.f32 %v523_v30, %v504_v29  ;;  %v488_v37 = vadd.f32 %v487_v33, %v468_v31 }
  0xc7   :  { %v608_v34 = vpack.c.bf16 %v524_v32, %v486_v28 }
  0xc9   :  { %616 = vst [vmem:[#allocation7 + $0x20] sm:$0xff] %v608_v34 }
  0xcb   :  { %v506_v35 = vpop.f32.mrf.mxu2  ;;  %v537_v39 = vpop.f32.mrf.mxu0 }
  0xcc   :  { %v525_v36 = vpop.f32.mrf.mxu3  ;;  %v556_v40 = vpop.f32.mrf.mxu1 }
  0xcd   :  { %v526_v38 = vadd.f32 %v525_v36, %v506_v35  ;;  %v557_v42 = vadd.f32 %v556_v40, %v537_v39 }
  0xcf   :  { %v610_v41 = vpack.c.bf16 %v526_v38, %v488_v37 }
  0xd1   :  { %618 = vst [vmem:[#allocation7 + $0x30] sm:$0xff] %v610_v41 }
  0xd3   :  { %v575_v43 = vpop.f32.mrf.mxu2  ;;  %v539_v47 = vpop.f32.mrf.mxu0 }
  0xd4   :  { %v594_v45 = vpop.f32.mrf.mxu3  ;;  %v558_v48 = vpop.f32.mrf.mxu1 }
  0xd5   :  { %v595_v46 = vadd.f32 %v594_v45, %v575_v43  ;;  %v559_v53 = vadd.f32 %v558_v48, %v539_v47 }
  0xd7   :  { %v605_v50 = vpack.c.bf16 %v595_v46, %v557_v42 }
  0xd9   :  { %613 = vst [vmem:[#allocation7 + $0x8] sm:$0xff] %v605_v50 }
  0xdb   :  { %v577_v51 = vpop.f32.mrf.mxu2  ;;  %v542_v56 = vpop.f32.mrf.mxu0 }
  0xdc   :  { %v596_v52 = vpop.f32.mrf.mxu3  ;;  %v561_v57 = vpop.f32.mrf.mxu1 }
  0xdd   :  { %v597_v54 = vadd.f32 %v596_v52, %v577_v51  ;;  %v562_v58 = vadd.f32 %v561_v57, %v542_v56 }
  0xdf   :  { %v607_v55 = vpack.c.bf16 %v597_v54, %v559_v53 }
  0xe1   :  { %615 = vst [vmem:[#allocation7 + $0x18] sm:$0xff] %v607_v55 }
  0xe3   :  { %v580_v59 = vpop.f32.mrf.mxu2  ;;  %v544_v63 = vpop.f32.mrf.mxu0 }
  0xe4   :  { %v599_v60 = vpop.f32.mrf.mxu3  ;;  %v563_v0 = vpop.f32.mrf.mxu1 }
  0xe5   :  { %v600_v61 = vadd.f32 %v599_v60, %v580_v59  ;;  %v564_v3 = vadd.f32 %v563_v0, %v544_v63 }
  0xe7   :  { %v609_v62 = vpack.c.bf16 %v600_v61, %v562_v58 }
  0xe9   :  { %617 = vst [vmem:[#allocation7 + $0x28] sm:$0xff] %v609_v62 }
  0xeb   :  { %v582_v1 = vpop.f32.mrf.mxu2 }
  0xec   :  { %v601_v2 = vpop.f32.mrf.mxu3 }
  0xed   :  { %v602_v4 = vadd.f32 %v601_v2, %v582_v1 }
  0xef   :  { %v611_v5 = vpack.c.bf16 %v602_v4, %v564_v3 }
  0xf1   :  { %619 = vst [vmem:[#allocation7 + $0x38] sm:$0xff] %v611_v5 }
  0xf2   :  { %632 = dma.vmem_to_hbm [thread:$0]  %s625_s1, 1024, %s627_s25, [#allocation4], %s1069_s21, %s1069_s21, %s1070_s22  }
  0xf3   :  { %1063 = dma.done.wait [#allocation4], 1024  }
  0xf4   :  { %1064 = vsyncadd [#allocation4], 4294966272 }
  0xf5   :  { %637 = vsyncpa [#allocation3], 1 }
  0xf6   :  { %638 = vsyncpa [#allocation6], 1 }
  0xf7   :  { %639 = vsyncpa [#allocation4], 1 }

</bundles_post_ra>
